<compile_context>
chip_gen: v6e
topology: v6e:2x2x1
jax: 0.10.0
libtpu: 0.0.40
codegen_flags: <defaults>
</compile_context>

<pallas_src>
import jax
import jax.numpy as jnp
from jax.experimental import pallas as pl
from jax.experimental.pallas import tpu as pltpu


def _round_up(x, m):
    return ((x + m - 1) // m) * m


def _cdiv(a, b):
    return -(-a // b)


# ---------------------------------------------------------------------------
# Kernels
# ---------------------------------------------------------------------------
def _mlp_resident_kernel(x_ref, w1_ref, b1_ref, w2_ref, b2_ref, o_ref):
    # x_ref : [TB, F]      (streamed batch tile)
    # w1_ref: [F, H]       b1_ref: [1, H]     (VMEM-resident, single-buffered)
    # w2_ref: [H, O_eff]   b2_ref: [1, O_eff] (VMEM-resident, single-buffered)
    # o_ref : [TB, O_eff]
    x = x_ref[...]
    h = jnp.dot(x, w1_ref[...], preferred_element_type=jnp.float32)
    h = jnp.maximum(h + b1_ref[...], 0.0)
    y = jnp.dot(h.astype(w2_ref.dtype), w2_ref[...],
                preferred_element_type=jnp.float32)
    o_ref[...] = (y + b2_ref[...]).astype(o_ref.dtype)


def _mlp_tiled_kernel(x_ref, w1_ref, b1_ref, w2_ref, b2_ref, o_ref, acc_ref):
    # Fallback for weights too large to keep resident (e.g. on v7x's 64 MiB).
    # Grid = (batch tile i, output tile j, hidden chunk k); k is the reduction.
    # ReLU is elementwise over the hidden dim, so applying it per H-chunk is exact.
    k = pl.program_id(2)

    @pl.when(k == 0)
    def _():
        acc_ref[...] = jnp.zeros_like(acc_ref)

    h = jnp.dot(x_ref[...], w1_ref[...], preferred_element_type=jnp.float32)
    h = jnp.maximum(h + b1_ref[...], 0.0)
    acc_ref[...] += jnp.dot(h.astype(w2_ref.dtype), w2_ref[...],
                            preferred_element_type=jnp.float32)

    @pl.when(k == pl.num_programs(2) - 1)
    def _():
        o_ref[...] = (acc_ref[...] + b2_ref[...]).astype(o_ref.dtype)


# ---------------------------------------------------------------------------
# Planning / parameter preparation (one-time, hoisted out of the forward path)
# ---------------------------------------------------------------------------
def plan_mlp(n_feature, n_hidden, n_output, *,
             compute_dtype=jnp.float32,
             out_dtype=jnp.float32,
             vmem_budget_bytes=48 * 1024 * 1024,
             force_tiled=False):
    """Pick layout (padding) and resident-vs-tiled strategy from shapes alone."""
    itemsize = jnp.dtype(compute_dtype).itemsize

    # Lane-dense output stores only pay off when the padding blow-up is modest.
    o_pad_resident = _round_up(n_output, 128) if n_output >= 64 else n_output

    weight_bytes = ((n_feature * n_hidden + n_hidden * o_pad_resident) * itemsize
                    + (n_hidden + o_pad_resident) * 4)
    # Keep weights resident only if they leave >= half the VMEM budget for the
    # streamed x / out tiles and pipeline headroom.
    tiled = bool(force_tiled) or weight_bytes > vmem_budget_bytes // 2

    plan = dict(n_feature=n_feature, n_hidden=n_hidden, n_output=n_output,
                compute_dtype=compute_dtype, out_dtype=out_dtype,
                vmem_budget_bytes=vmem_budget_bytes, tiled=tiled)

    if not tiled:
        plan.update(H_pad=n_hidden, O_pad=o_pad_resident)
    else:
        # ~512-deep K chunks / ~256-wide N tiles feed the 2x256x256 MXUs on
        # v6e/v7x (128 would only be optimal on v5e's 4x128x128 MXU).
        n_h = max(1, _cdiv(n_hidden, 512))
        th = _round_up(_cdiv(n_hidden, n_h), 128)
        n_o = max(1, _cdiv(n_output, 256))
        to = _round_up(_cdiv(n_output, n_o), 128)
        plan.update(H_pad=n_h * th, O_pad=n_o * to, TH=th, TO=to)
    return plan


def prepare_params(plan, w1, b1, w2, b2):
    """One-time cast + pad of weights (do NOT call per forward step).

    w1: [F, H], b1: [H], w2: [H, O], b2: [O]  (already transposed from
    PyTorch's [out, in] Linear layout). Zero padding of H/O columns/rows is
    exact: padded hidden units are relu(0+0)=0 and padded w2 rows are 0.
    """
    cdt = plan["compute_dtype"]
    H, O = plan["n_hidden"], plan["n_output"]
    H_pad, O_pad = plan["H_pad"], plan["O_pad"]

    w1p = jnp.pad(w1.astype(cdt), ((0, 0), (0, H_pad - H)))
    b1p = jnp.pad(b1.astype(jnp.float32), (0, H_pad - H)).reshape(1, H_pad)
    w2p = jnp.pad(w2.astype(cdt), ((0, H_pad - H), (0, O_pad - O)))
    b2p = jnp.pad(b2.astype(jnp.float32), (0, O_pad - O)).reshape(1, O_pad)
    return w1p, b1p, w2p, b2p


def _choose_batch_tiling(B, tb_max, sublane, per_row_bytes, free_bytes):
    """Pick (TB, B_pad). Guarantees >=2 (even #) tiles once B >= 2*sublane so a
    'parallel' batch axis keeps both v7x TensorCores busy; clamps TB so the
    streamed buffers fit the remaining VMEM budget."""
    tb_cap = max(int(free_bytes // max(per_row_bytes, 1)), 2 * sublane)
    tb_max = max(min(tb_max, tb_cap), sublane)
    if B < 2 * sublane:
        tb = _round_up(max(B, sublane), sublane)
        return tb, tb
    n_tiles = max(2, _cdiv(B, tb_max))
    if n_tiles % 2:
        n_tiles += 1
    tb = _round_up(_cdiv(B, n_tiles), sublane)
    return tb, n_tiles * tb


# ---------------------------------------------------------------------------
# Forward pass
# ---------------------------------------------------------------------------
def mlp_forward(x, params, plan, *, tb_max=1024):
    """x: [B, F]  ->  [B, n_output] in plan['out_dtype'] (f32 accumulation)."""
    w1p, b1p, w2p, b2p = params
    B, F = x.shape
    assert F == plan["n_feature"]
    O = plan["n_output"]
    H_pad, O_pad = plan["H_pad"], plan["O_pad"]
    cdt, odt = plan["compute_dtype"], plan["out_dtype"]
    itemsize = jnp.dtype(cdt).itemsize
    out_itemsize = jnp.dtype(odt).itemsize
    sublane = 16 if itemsize == 2 else 8          # bf16 sublane packing
    budget = plan["vmem_budget_bytes"]

    if not plan["tiled"]:
        # Single-buffered resident weights + double-buffered x / out tiles.
        weight_bytes = ((w1p.size + w2p.size) * itemsize
                        + (b1p.size + b2p.size) * 4)
        per_row = 2 * F * itemsize + 2 * O_pad * out_itemsize
    else:
        TH, TO = plan["TH"], plan["TO"]
        weight_bytes = (2 * (F * TH + TH * TO) * itemsize + 2 * (TH + TO) * 4)
        per_row = 2 * F * itemsize + 2 * TO * out_itemsize + TO * 4  # + f32 acc

    TB, B_pad = _choose_batch_tiling(B, tb_max, sublane, per_row,
                                     budget - weight_bytes)

    x_c = x.astype(cdt)
    if B_pad != B:
        x_c = jnp.pad(x_c, ((0, B_pad - B), (0, 0)))

    # Only raise the scoped-VMEM limit when the estimate (with headroom)
    # exceeds the 32 MiB default; never exceed the chip-conservative budget.
    vmem_est = int(weight_bytes + TB * per_row)
    need = vmem_est * 3 // 2
    default_scoped = 32 * 1024 * 1024
    vmem_limit = int(min(max(need, default_scoped), budget)) \
        if need > default_scoped else None

    if not plan["tiled"]:
        resident = pl.Buffered(1)   # constant index map -> no double buffer
        grid = (B_pad // TB,)
        grid_spec = pl.GridSpec(
            grid=grid,
            in_specs=[
                pl.BlockSpec((TB, F), lambda i: (i, 0)),                # x: streamed
                pl.BlockSpec((F, H_pad), lambda i: (0, 0), pipeline_mode=resident),
                pl.BlockSpec((1, H_pad), lambda i: (0, 0), pipeline_mode=resident),
                pl.BlockSpec((H_pad, O_pad), lambda i: (0, 0), pipeline_mode=resident),
                pl.BlockSpec((1, O_pad), lambda i: (0, 0), pipeline_mode=resident),
            ],
            out_specs=pl.BlockSpec((TB, O_pad), lambda i: (i, 0)),
        )
        kernel = _mlp_resident_kernel
        semantics = ("parallel",)
    else:
        TH, TO = plan["TH"], plan["TO"]
        grid = (B_pad // TB, O_pad // TO, H_pad // TH)
        grid_spec = pltpu.PrefetchScalarGridSpec(
            num_scalar_prefetch=0,
            grid=grid,
            in_specs=[
                pl.BlockSpec((TB, F), lambda i, j, k: (i, 0)),   # x resident over j,k
                pl.BlockSpec((F, TH), lambda i, j, k: (0, k)),
                pl.BlockSpec((1, TH), lambda i, j, k: (0, k)),
                pl.BlockSpec((TH, TO), lambda i, j, k: (k, j)),
                pl.BlockSpec((1, TO), lambda i, j, k: (0, j)),
            ],
            out_specs=pl.BlockSpec((TB, TO), lambda i, j, k: (i, j)),
            scratch_shapes=[pltpu.VMEM((TB, TO), jnp.float32)],
        )
        kernel = _mlp_tiled_kernel
        semantics = ("parallel", "parallel", "arbitrary")

    cost = pl.CostEstimate(
        flops=2 * B_pad * F * H_pad + 2 * B_pad * H_pad * O_pad,
        transcendentals=0,
        bytes_accessed=(B_pad * F * itemsize
                        + F * H_pad * itemsize + H_pad * 4
                        + H_pad * O_pad * itemsize + O_pad * 4
                        + B_pad * O_pad * out_itemsize),
    )

    out_pad = pl.pallas_call(
        kernel,
        out_shape=jax.ShapeDtypeStruct((B_pad, O_pad), odt),
        grid_spec=grid_spec,
        compiler_params=pltpu.CompilerParams(
            dimension_semantics=semantics,
            vmem_limit_bytes=vmem_limit),
        cost_estimate=cost,
    )(x_c, w1p, b1p, w2p, b2p)

    return out_pad[:B, :O]


# ---------------------------------------------------------------------------
# Parameter init (mirrors torch.nn.Linear's U(-1/sqrt(fan_in), +) scheme)
# ---------------------------------------------------------------------------
def init_params(key, n_feature, n_hidden, n_output):
    k1, k2, k3, k4 = jax.random.split(key, 4)
    bound1 = 1.0 / (n_feature ** 0.5)
    bound2 = 1.0 / (n_hidden ** 0.5)
    # Stored already transposed to [in, out] for the kernels.
    w1 = jax.random.uniform(k1, (n_feature, n_hidden), jnp.float32, -bound1, bound1)
    b1 = jax.random.uniform(k2, (n_hidden,), jnp.float32, -bound1, bound1)
    w2 = jax.random.uniform(k3, (n_hidden, n_output), jnp.float32, -bound2, bound2)
    b2 = jax.random.uniform(k4, (n_output,), jnp.float32, -bound2, bound2)
    return w1, b1, w2, b2


if __name__ == "__main__":
    # Small shapes consistent with _Net(n_feature, n_hidden, n_output).
    B, n_feature, n_hidden, n_output = 8, 16, 32, 4

    key = jax.random.PRNGKey(0)
    kx, kp = jax.random.split(key)
    x = jax.random.normal(kx, (B, n_feature), jnp.float32)
    w1, b1, w2, b2 = init_params(kp, n_feature, n_hidden, n_output)

    # Pure-JAX reference of the same semantics.
    ref = jnp.maximum(x @ w1 + b1, 0.0) @ w2 + b2

    # Main (weight-resident) path. f32 holds the 1e-5 tolerance; pass
    # compute_dtype=jnp.bfloat16 on v5e/v6e/v7x for the mem-bound speedup.
    plan = plan_mlp(n_feature, n_hidden, n_output)
    params = prepare_params(plan, w1, b1, w2, b2)   # one-time cast/pad
    out = jax.block_until_ready(mlp_forward(x, params, plan))
    assert out.shape == (B, n_output)
    assert jnp.allclose(out, ref, atol=1e-5, rtol=1e-5)

    # Also exercise the large-weight fallback (H-chunked / O-tiled) path that
    # the planner selects automatically when the weights exceed the VMEM budget
    # (e.g. big n_hidden on v7x's 64 MiB per-TC VMEM).
    plan_t = plan_mlp(n_feature, n_hidden, n_output, force_tiled=True)
    params_t = prepare_params(plan_t, w1, b1, w2, b2)
    out_t = jax.block_until_ready(mlp_forward(x, params_t, plan_t))
    assert out_t.shape == (B, n_output)
    assert jnp.allclose(out_t, ref, atol=1e-5, rtol=1e-5)

    print("KERNEL_OK")
</pallas_src>

<mosaic_0001>
module attributes {stable_mosaic.version = 11 : i64} {
  func.func @_mlp_resident_kernel(%arg0: i32, %arg1: memref<8x16xf32, #tpu.memory_space<vmem>>, %arg2: memref<16x32xf32, #tpu.memory_space<vmem>>, %arg3: memref<1x32xf32, #tpu.memory_space<vmem>>, %arg4: memref<32x4xf32, #tpu.memory_space<vmem>>, %arg5: memref<1x4xf32, #tpu.memory_space<vmem>>, %arg6: memref<8x4xf32, #tpu.memory_space<vmem>>) attributes {dimension_semantics = [#tpu.dimension_semantics<parallel>], iteration_bounds = array<i64: 1>, scalar_prefetch = 0 : i64, scratch_operands = 0 : i64, tpu.core_type = #tpu.core_type<tc>, window_params = [{transform_indices = @transform_0, window_bounds = array<i64: 8, 16>}, {pipeline_mode = #tpu.pipeline_mode<synchronous>, transform_indices = @transform_1, window_bounds = array<i64: 16, 32>}, {pipeline_mode = #tpu.pipeline_mode<synchronous>, transform_indices = @transform_2, window_bounds = array<i64: 1, 32>}, {pipeline_mode = #tpu.pipeline_mode<synchronous>, transform_indices = @transform_3, window_bounds = array<i64: 32, 4>}, {pipeline_mode = #tpu.pipeline_mode<synchronous>, transform_indices = @transform_4, window_bounds = array<i64: 1, 4>}, {transform_indices = @transform_5, window_bounds = array<i64: 8, 4>}]} {
    %c0 = arith.constant 0 : index
    %c0_0 = arith.constant 0 : index
    %0 = vector.load %arg1[%c0, %c0_0] : memref<8x16xf32, #tpu.memory_space<vmem>>, vector<8x16xf32>
    %c0_1 = arith.constant 0 : index
    %c0_2 = arith.constant 0 : index
    %1 = vector.load %arg2[%c0_1, %c0_2] : memref<16x32xf32, #tpu.memory_space<vmem>>, vector<16x32xf32>
    %cst = arith.constant dense<0.000000e+00> : vector<8x32xf32>
    %2 = tpu.matmul %0, %1, %cst {dimension_numbers = #tpu.dot_dimension_numbers<[1], [0], [0], [1], [0, 0, 1, 1], [], []>} : vector<8x16xf32>, vector<16x32xf32>, vector<8x32xf32> -> vector<8x32xf32>
    %c0_3 = arith.constant 0 : index
    %c0_4 = arith.constant 0 : index
    %3 = vector.load %arg3[%c0_3, %c0_4] : memref<1x32xf32, #tpu.memory_space<vmem>>, vector<1x32xf32>
    %4 = vector.broadcast %3 : vector<1x32xf32> to vector<8x32xf32>
    %5 = arith.addf %2, %4 : vector<8x32xf32>
    %cst_5 = arith.constant 0.000000e+00 : f32
    %6 = vector.broadcast %cst_5 : f32 to vector<8x32xf32>
    %7 = arith.maximumf %5, %6 : vector<8x32xf32>
    %c0_6 = arith.constant 0 : index
    %c0_7 = arith.constant 0 : index
    %8 = vector.load %arg4[%c0_6, %c0_7] : memref<32x4xf32, #tpu.memory_space<vmem>>, vector<32x4xf32>
    %cst_8 = arith.constant dense<0.000000e+00> : vector<8x4xf32>
    %9 = tpu.matmul %7, %8, %cst_8 {dimension_numbers = #tpu.dot_dimension_numbers<[1], [0], [0], [1], [0, 0, 1, 1], [], []>} : vector<8x32xf32>, vector<32x4xf32>, vector<8x4xf32> -> vector<8x4xf32>
    %c0_9 = arith.constant 0 : index
    %c0_10 = arith.constant 0 : index
    %10 = vector.load %arg5[%c0_9, %c0_10] : memref<1x4xf32, #tpu.memory_space<vmem>>, vector<1x4xf32>
    %11 = vector.broadcast %10 : vector<1x4xf32> to vector<8x4xf32>
    %12 = arith.addf %9, %11 : vector<8x4xf32>
    %c0_11 = arith.constant 0 : index
    %c0_12 = arith.constant 0 : index
    %13 = vector.load %arg6[%c0_11, %c0_12] : memref<8x4xf32, #tpu.memory_space<vmem>>, vector<8x4xf32>
    tpu.vector_store %arg6[%c0_11, %c0_12], %12 {strides = array<i32>} : memref<8x4xf32, #tpu.memory_space<vmem>>, vector<8x4xf32>,
    return
  }
  func.func @transform_0(%arg0: i32) -> (i32, i32) {
    %c0_i32 = arith.constant 0 : i32
    %c0_i32_0 = arith.constant 0 : i32
    return %arg0, %c0_i32 : i32, i32
  }
  func.func @transform_1(%arg0: i32) -> (i32, i32) {
    %c0_i32 = arith.constant 0 : i32
    %c0_i32_0 = arith.constant 0 : i32
    %c0_i32_1 = arith.constant 0 : i32
    return %c0_i32, %c0_i32_0 : i32, i32
  }
  func.func @transform_2(%arg0: i32) -> (i32, i32) {
    %c0_i32 = arith.constant 0 : i32
    %c0_i32_0 = arith.constant 0 : i32
    %c0_i32_1 = arith.constant 0 : i32
    return %c0_i32, %c0_i32_0 : i32, i32
  }
  func.func @transform_3(%arg0: i32) -> (i32, i32) {
    %c0_i32 = arith.constant 0 : i32
    %c0_i32_0 = arith.constant 0 : i32
    %c0_i32_1 = arith.constant 0 : i32
    return %c0_i32, %c0_i32_0 : i32, i32
  }
  func.func @transform_4(%arg0: i32) -> (i32, i32) {
    %c0_i32 = arith.constant 0 : i32
    %c0_i32_0 = arith.constant 0 : i32
    %c0_i32_1 = arith.constant 0 : i32
    return %c0_i32, %c0_i32_0 : i32, i32
  }
  func.func @transform_5(%arg0: i32) -> (i32, i32) {
    %c0_i32 = arith.constant 0 : i32
    %c0_i32_0 = arith.constant 0 : i32
    return %arg0, %c0_i32 : i32, i32
  }
}

</mosaic_0001>

<bundles_post_ra>
// kernel: tpu_custom_call.1
= control target key start
LH: loop header
LB: loop body
LE: loop exit
PB: predicated region body
PF: predicated region fallthrough
CT: control target
= control target key end

     0   :  { %v228_v0 = vmov 0.0   ;;  %vm229_vm0 = vmmov 0   ;;  %vm30_vm1 = vcmask 130048   ;;  %vm116_vm2 = vcmask 261120   ;;  %s290_s1 = inlined_call_operand.vmem [shape: f32[16,32], index: 1, kind: input, shape index: {}]   ;;  %s291_s0 = inlined_call_operand.vmem [shape: f32[8,16], index: 0, kind: input, shape index: {}]   ;;  %s292_s3 = inlined_call_operand.vmem [shape: f32[32,4], index: 3, kind: input, shape index: {}]   ;;  %s293_s2 = inlined_call_operand.vmem [shape: f32[1,32], index: 2, kind: input, shape index: {}]   ;;  %s294_s4 = inlined_call_operand.vmem [shape: f32[1,4], index: 4, kind: input, shape index: {}]   ;;  %s295_s5 = inlined_call_operand.vmem [shape: f32[8,4], index: 5, kind: output, shape index: {}]  }
   0x1   :  { %208 = vmatprep.subr.mxu0 %v228_v0  ;;  %v22_v1 = vld [vmem:[%s290_s1 + $0x8] sm:$0xff]  ;;  %v21_v2 = vld [vmem:[%s290_s1] sm:$0xff]  ;;  %212 = vmatprep.mubr.msk.f32.mxu0 %vm229_vm0, %v228_v0  ;;  %v108_v4 = vld [vmem:[%s292_s3 + $0x18] sm:$0xff]  ;;  %vm190_vm3 = vcmask 31744  }
   0x2   :  { %209 = vmatpush3.msra.mxu0 %v22_v1  ;;  %v20_v3 = vld [vmem:[%s291_s0] sm:$0xff]  ;;  %215 = vmatprep.subr.mxu1 %v228_v0  ;;  %v107_v5 = vld [vmem:[%s292_s3 + $0x10] sm:$0xff]  ;;  %v106_v6 = vld [vmem:[%s292_s3 + $0x8] sm:$0xff] }
   0x3   :  { %210 = vmatprep.subr.mxu0 %v228_v0  ;;  %216 = vmatpush3.msra.mxu1 %v108_v4  ;;  %v105_v7 = vld [vmem:[%s292_s3] sm:$0xff] }
   0x4   :  { %211 = vmatpush3.msra.mxu0 %v21_v2  ;;  %217 = vmatprep.subr.mxu1 %v228_v0  ;;  %v196_v8 = vld [vmem:[%s293_s2] ss:$0 sm:$0xff] }
   0x5   :  { %213 = vmatmul.mubr.msk.f32.vlgmr.msra.gmra.mxu0 %vm30_vm1, %v20_v3  ;;  %223 = vmatprep.mubr.msk.f32.mxu1 %vm229_vm0, %v228_v0  ;;  %v198_v13 = vld [vmem:[%s294_s4] ss:$0 sm:$0xff] }
   0x6   :  { %218 = vmatpush3.msra.mxu1 %v107_v5 }
   0x7   :  { %219 = vmatprep.subr.mxu1 %v228_v0 }
   0x8   :  { %220 = vmatpush3.msra.mxu1 %v106_v6 }
   0x9   :  { %221 = vmatprep.subr.mxu1 %v228_v0 }
   0xa   :  { %222 = vmatpush3.msra.mxu1 %v105_v7 }
  0xc5   :  { %v100_v9 = vpop.f32.mrf.mxu0 }
  0xc6   :  { %v101_v10 = vadd.f32 %v196_v8, %v100_v9 }
  0xc7   :  { %v214_v11 = vpop.f32.mrf.mxu0 }
  0xc8   :  { %v104_v12 = vmax.f32 %v101_v10, 0.0 }
  0xca   :  { %224 = vmatmul.mubr.msk.f32.vlgmr.msra.gmra.mxu1 %vm116_vm2, %v104_v12 }
 0x18a   :  { %v186_v14 = vpop.f32.mrf.mxu1 }
 0x18b   :  { %v187_v15 = vadd.f32 %v198_v13, %v186_v14 }
 0x18c   :  { %v225_v16 = vpop.f32.mrf.mxu1 }
 0x18d   :  { %191 = vst.msk [vmem:[%s295_s5] sm:$0xff] %vm190_vm3, %v187_v15 }

</bundles_post_ra>
